<compile_context>
chip_gen: v5e
topology: v5e:2x2
jax: 0.10.0
libtpu: 0.0.40
codegen_flags: <defaults>
</compile_context>

<pallas_src>
import functools

import jax
import jax.numpy as jnp
from jax.experimental import pallas as pl
from jax.experimental.pallas import tpu as pltpu

_LANE = 128
_SUBLANE = 8


def _round_up(x, m):
    return ((x + m - 1) // m) * m


# ---------------------------------------------------------------------------
# Kernel
# ---------------------------------------------------------------------------
def _mlp_kernel(x_ref, w1_ref, b1_ref, w2_ref, b2_ref, o_ref):
    # x:  (block_b, D_pad)   w1: (D_pad, H_pad)   b1: (1, H_pad)
    # w2: (H_pad, A_pad)     b2: (1, A_pad)       o:  (block_b, A_pad)
    h = jnp.dot(x_ref[...], w1_ref[...],
                preferred_element_type=jnp.float32) + b1_ref[...]
    h = jnp.maximum(h, 0.0)
    out = jnp.dot(h, w2_ref[...],
                  preferred_element_type=jnp.float32) + b2_ref[...]
    o_ref[...] = out.astype(o_ref.dtype)


# ---------------------------------------------------------------------------
# One-time parameter preparation (keep OFF the hot path)
# ---------------------------------------------------------------------------
def prepare_params(w1, b1, w2, b2):
    """Pad parameters once (at init / target-network sync).

    w1: (state_dim, hidden)   b1: (hidden,)
    w2: (hidden, n_actions)   b2: (n_actions,)
    Returns a tuple consumed by `policy_network_forward`.
    Padding is exact: padded rows/cols are zero, ReLU(0) = 0.
    """
    D, H = w1.shape
    A = w2.shape[1]
    D_pad = _round_up(D, _SUBLANE)          # aligned input rows for DMA
    H_pad = _round_up(H, _LANE)             # lane-dense hidden (MXU width)
    A_pad = _round_up(A, _SUBLANE)          # small output pad -> small writeback

    w1_p = jnp.zeros((D_pad, H_pad), jnp.float32).at[:D, :H].set(w1)
    b1_p = jnp.zeros((1, H_pad), jnp.float32).at[0, :H].set(b1)
    w2_p = jnp.zeros((H_pad, A_pad), jnp.float32).at[:H, :A].set(w2)
    b2_p = jnp.zeros((1, A_pad), jnp.float32).at[0, :A].set(b2)
    return (w1_p, b1_p, w2_p, b2_p, int(A))


# ---------------------------------------------------------------------------
# Forward pass (jitted; pad + pallas_call + slice fuse together)
# ---------------------------------------------------------------------------
@functools.partial(jax.jit, static_argnames=("n_actions", "num_blocks"))
def _forward_padded(state, w1_p, b1_p, w2_p, b2_p, *, n_actions, num_blocks):
    B, D = state.shape
    D_pad, H_pad = w1_p.shape
    A_pad = w2_p.shape[1]

    nb = num_blocks
    block_b = _round_up(pl.cdiv(B, nb), _SUBLANE)
    B_pad = block_b * nb

    x_p = state
    if B_pad != B or D_pad != D:
        x_p = jnp.zeros((B_pad, D_pad), state.dtype).at[:B, :D].set(state)

    flops = 2 * B_pad * (D_pad * H_pad + H_pad * A_pad)
    bytes_accessed = 4 * (B_pad * D_pad + D_pad * H_pad + H_pad
                          + H_pad * A_pad + A_pad + B_pad * A_pad)

    out = pl.pallas_call(
        _mlp_kernel,
        out_shape=jax.ShapeDtypeStruct((B_pad, A_pad), jnp.float32),
        grid=(nb,),
        in_specs=[
            pl.BlockSpec((block_b, D_pad), lambda i: (i, 0)),   # batch-tiled x
            pl.BlockSpec((D_pad, H_pad), lambda i: (0, 0)),     # weights resident
            pl.BlockSpec((1, H_pad), lambda i: (0, 0)),
            pl.BlockSpec((H_pad, A_pad), lambda i: (0, 0)),
            pl.BlockSpec((1, A_pad), lambda i: (0, 0)),
        ],
        out_specs=pl.BlockSpec((block_b, A_pad), lambda i: (i, 0)),
        compiler_params=pltpu.CompilerParams(
            dimension_semantics=("parallel",),   # shard batch blocks across TCs (v7x)
        ),
        cost_estimate=pl.CostEstimate(
            flops=flops, transcendentals=0, bytes_accessed=bytes_accessed),
    )(x_p, w1_p, b1_p, w2_p, b2_p)

    return out[:B, :n_actions]


def _is_multi_tensorcore():
    try:
        kind = jax.devices()[0].device_kind.lower()
    except Exception:
        return False
    return "v7" in kind   # v7x: 2 TensorCores per chip


def _auto_num_blocks(batch):
    # Single grid step on single-TC chips (v5e/v6e); split into 2 "parallel"
    # blocks only for large batches on multi-TC chips (v7x).
    if batch >= 1024 and _is_multi_tensorcore():
        return 2
    return 1


def policy_network_forward(state, params, num_blocks=None):
    """Forward pass of PolicyNetwork.

    state:  (B, state_dim) float32
    params: output of `prepare_params(w1, b1, w2, b2)`
    returns: (B, n_actions) float32 action-values
    """
    w1_p, b1_p, w2_p, b2_p, n_actions = params
    if num_blocks is None:
        num_blocks = _auto_num_blocks(state.shape[0])
    return _forward_padded(state, w1_p, b1_p, w2_p, b2_p,
                           n_actions=n_actions, num_blocks=num_blocks)


def _reference_forward(state, w1, b1, w2, b2):
    h = jnp.maximum(state @ w1 + b1, 0.0)
    return h @ w2 + b2


if __name__ == "__main__":
    # CartPole-like env: state_dim=4, n_actions=2, hidden_size=32.
    batch, state_dim, hidden, n_actions = 8, 4, 32, 2

    key = jax.random.PRNGKey(0)
    k_x, k_w1, k_b1, k_w2, k_b2, k_big = jax.random.split(key, 6)

    # Deterministic synthetic parameter init (Kaiming-uniform-ish, like nn.Linear).
    lim1 = 1.0 / jnp.sqrt(state_dim)
    lim2 = 1.0 / jnp.sqrt(hidden)
    w1 = jax.random.uniform(k_w1, (state_dim, hidden), jnp.float32, -lim1, lim1)
    b1 = jax.random.uniform(k_b1, (hidden,), jnp.float32, -lim1, lim1)
    w2 = jax.random.uniform(k_w2, (hidden, n_actions), jnp.float32, -lim2, lim2)
    b2 = jax.random.uniform(k_b2, (n_actions,), jnp.float32, -lim2, lim2)

    state = jax.random.normal(k_x, (batch, state_dim), jnp.float32)

    # One-time parameter prep (off the hot path).
    params = prepare_params(w1, b1, w2, b2)

    # 1) Small (action-selection sized) batch.
    out = jax.block_until_ready(policy_network_forward(state, params))
    ref = _reference_forward(state, w1, b1, w2, b2)
    assert out.shape == (batch, n_actions)
    assert jnp.allclose(out, ref, atol=1e-5, rtol=1e-5), "small-batch mismatch"

    # 2) Replay-buffer-sized batch (non-multiple-of-8-free sizes work too).
    big_state = jax.random.normal(k_big, (1000, state_dim), jnp.float32)
    out_big = jax.block_until_ready(policy_network_forward(big_state, params))
    ref_big = _reference_forward(big_state, w1, b1, w2, b2)
    assert out_big.shape == (1000, n_actions)
    assert jnp.allclose(out_big, ref_big, atol=1e-5, rtol=1e-5), "big-batch mismatch"

    # 3) Explicit 2-block path (what v7x auto-selects for B >= 1024).
    out_split = jax.block_until_ready(
        policy_network_forward(big_state, params, num_blocks=2))
    assert jnp.allclose(out_split, ref_big, atol=1e-5, rtol=1e-5), "2-block mismatch"

    print("KERNEL_OK")
</pallas_src>

<mosaic_0001>
module attributes {stable_mosaic.version = 11 : i64} {
  func.func @_mlp_kernel(%arg0: i32, %arg1: memref<8x8xf32, #tpu.memory_space<vmem>>, %arg2: memref<8x128xf32, #tpu.memory_space<vmem>>, %arg3: memref<1x128xf32, #tpu.memory_space<vmem>>, %arg4: memref<128x8xf32, #tpu.memory_space<vmem>>, %arg5: memref<1x8xf32, #tpu.memory_space<vmem>>, %arg6: memref<8x8xf32, #tpu.memory_space<vmem>>) attributes {dimension_semantics = [#tpu.dimension_semantics<parallel>], iteration_bounds = array<i64: 1>, scalar_prefetch = 0 : i64, scratch_operands = 0 : i64, tpu.core_type = #tpu.core_type<tc>, window_params = [{transform_indices = @transform_0, window_bounds = array<i64: 8, 8>}, {pipeline_mode = #tpu.pipeline_mode<synchronous>, transform_indices = @transform_1, window_bounds = array<i64: 8, 128>}, {pipeline_mode = #tpu.pipeline_mode<synchronous>, transform_indices = @transform_2, window_bounds = array<i64: 1, 128>}, {pipeline_mode = #tpu.pipeline_mode<synchronous>, transform_indices = @transform_3, window_bounds = array<i64: 128, 8>}, {pipeline_mode = #tpu.pipeline_mode<synchronous>, transform_indices = @transform_4, window_bounds = array<i64: 1, 8>}, {transform_indices = @transform_5, window_bounds = array<i64: 8, 8>}]} {
    %c0 = arith.constant 0 : index
    %c0_0 = arith.constant 0 : index
    %0 = vector.load %arg1[%c0, %c0_0] : memref<8x8xf32, #tpu.memory_space<vmem>>, vector<8x8xf32>
    %c0_1 = arith.constant 0 : index
    %c0_2 = arith.constant 0 : index
    %1 = vector.load %arg2[%c0_1, %c0_2] : memref<8x128xf32, #tpu.memory_space<vmem>>, vector<8x128xf32>
    %cst = arith.constant dense<0.000000e+00> : vector<8x128xf32>
    %2 = tpu.matmul %0, %1, %cst {dimension_numbers = #tpu.dot_dimension_numbers<[1], [0], [0], [1], [0, 0, 1, 1], [], []>} : vector<8x8xf32>, vector<8x128xf32>, vector<8x128xf32> -> vector<8x128xf32>
    %c0_3 = arith.constant 0 : index
    %c0_4 = arith.constant 0 : index
    %3 = vector.load %arg3[%c0_3, %c0_4] : memref<1x128xf32, #tpu.memory_space<vmem>>, vector<1x128xf32>
    %4 = vector.broadcast %3 : vector<1x128xf32> to vector<8x128xf32>
    %5 = arith.addf %2, %4 : vector<8x128xf32>
    %cst_5 = arith.constant 0.000000e+00 : f32
    %6 = vector.broadcast %cst_5 : f32 to vector<8x128xf32>
    %7 = arith.maximumf %5, %6 : vector<8x128xf32>
    %c0_6 = arith.constant 0 : index
    %c0_7 = arith.constant 0 : index
    %8 = vector.load %arg4[%c0_6, %c0_7] : memref<128x8xf32, #tpu.memory_space<vmem>>, vector<128x8xf32>
    %cst_8 = arith.constant dense<0.000000e+00> : vector<8x8xf32>
    %9 = tpu.matmul %7, %8, %cst_8 {dimension_numbers = #tpu.dot_dimension_numbers<[1], [0], [0], [1], [0, 0, 1, 1], [], []>} : vector<8x128xf32>, vector<128x8xf32>, vector<8x8xf32> -> vector<8x8xf32>
    %c0_9 = arith.constant 0 : index
    %c0_10 = arith.constant 0 : index
    %10 = vector.load %arg5[%c0_9, %c0_10] : memref<1x8xf32, #tpu.memory_space<vmem>>, vector<1x8xf32>
    %11 = vector.broadcast %10 : vector<1x8xf32> to vector<8x8xf32>
    %12 = arith.addf %9, %11 : vector<8x8xf32>
    %c0_11 = arith.constant 0 : index
    %c0_12 = arith.constant 0 : index
    %13 = vector.load %arg6[%c0_11, %c0_12] : memref<8x8xf32, #tpu.memory_space<vmem>>, vector<8x8xf32>
    tpu.vector_store %arg6[%c0_11, %c0_12], %12 {strides = array<i32>} : memref<8x8xf32, #tpu.memory_space<vmem>>, vector<8x8xf32>,
    return
  }
  func.func @transform_0(%arg0: i32) -> (i32, i32) {
    %c0_i32 = arith.constant 0 : i32
    %c0_i32_0 = arith.constant 0 : i32
    return %arg0, %c0_i32 : i32, i32
  }
  func.func @transform_1(%arg0: i32) -> (i32, i32) {
    %c0_i32 = arith.constant 0 : i32
    %c0_i32_0 = arith.constant 0 : i32
    %c0_i32_1 = arith.constant 0 : i32
    return %c0_i32, %c0_i32_0 : i32, i32
  }
  func.func @transform_2(%arg0: i32) -> (i32, i32) {
    %c0_i32 = arith.constant 0 : i32
    %c0_i32_0 = arith.constant 0 : i32
    %c0_i32_1 = arith.constant 0 : i32
    return %c0_i32, %c0_i32_0 : i32, i32
  }
  func.func @transform_3(%arg0: i32) -> (i32, i32) {
    %c0_i32 = arith.constant 0 : i32
    %c0_i32_0 = arith.constant 0 : i32
    %c0_i32_1 = arith.constant 0 : i32
    return %c0_i32, %c0_i32_0 : i32, i32
  }
  func.func @transform_4(%arg0: i32) -> (i32, i32) {
    %c0_i32 = arith.constant 0 : i32
    %c0_i32_0 = arith.constant 0 : i32
    %c0_i32_1 = arith.constant 0 : i32
    return %c0_i32, %c0_i32_0 : i32, i32
  }
  func.func @transform_5(%arg0: i32) -> (i32, i32) {
    %c0_i32 = arith.constant 0 : i32
    %c0_i32_0 = arith.constant 0 : i32
    return %arg0, %c0_i32 : i32, i32
  }
}

</mosaic_0001>

<bundles_post_ra>
// kernel: _forward_padded.1
= control target key start
LH: loop header
LB: loop body
LE: loop exit
PB: predicated region body
PF: predicated region fallthrough
CT: control target
= control target key end

     0   :  { %vm26_vm0 = vcmask 64512   ;;  %s194_s1 = inlined_call_operand.vmem [shape: f32[8,128], index: 1, kind: input, shape index: {}]   ;;  %s195_s0 = inlined_call_operand.vmem [shape: f32[8,8], index: 0, kind: input, shape index: {}]   ;;  %s196_s3 = inlined_call_operand.vmem [shape: f32[128,8], index: 3, kind: input, shape index: {}]   ;;  %s197_s2 = inlined_call_operand.vmem [shape: f32[1,128], index: 2, kind: input, shape index: {}]   ;;  %s198_s4 = inlined_call_operand.vmem [shape: f32[1,8], index: 4, kind: input, shape index: {}]   ;;  %s199_s5 = inlined_call_operand.vmem [shape: f32[8,8], index: 5, kind: output, shape index: {}]  }
   0x1   :  { %v21_v0 = vld [vmem:[%s194_s1] sm:$0xff]  ;;  %v66_v2 = vld [vmem:[%s196_s3 + $0x78] sm:$0xff]  ;;  %v65_v3 = vld [vmem:[%s196_s3 + $0x70] sm:$0xff] }
   0x2   :  { %v20_v1 = vld [vmem:[%s195_s0] sm:$0xff]  ;;  %45 = vmatpush.msra.mxu0 %v21_v0  ;;  %71 = vmatpush.msra.mxu1 %v66_v2  ;;  %v64_v4 = vld [vmem:[%s196_s3 + $0x68] sm:$0xff]  ;;  %v62_v6 = vld [vmem:[%s196_s3 + $0x58] sm:$0xff] }
   0x3   :  { %96 = vmatmul.msk.f32.vlgmr.msra.gmra.mxu0 %vm26_vm0, %v20_v1  ;;  %v63_v5 = vld [vmem:[%s196_s3 + $0x60] sm:$0xff]  ;;  %v61_v7 = vld [vmem:[%s196_s3 + $0x50] sm:$0xff]  ;;  %v60_v8 = vld [vmem:[%s196_s3 + $0x48] sm:$0xff] }
   0x4   :  { %72 = vmatpush.msra.mxu1 %v65_v3  ;;  %v59_v9 = vld [vmem:[%s196_s3 + $0x40] sm:$0xff]  ;;  %v58_v10 = vld [vmem:[%s196_s3 + $0x38] sm:$0xff]  ;;  %v57_v11 = vld [vmem:[%s196_s3 + $0x30] sm:$0xff] }
   0x5   :  { %v56_v12 = vld [vmem:[%s196_s3 + $0x28] sm:$0xff]  ;;  %v55_v13 = vld [vmem:[%s196_s3 + $0x20] sm:$0xff]  ;;  %v54_v14 = vld [vmem:[%s196_s3 + $0x18] sm:$0xff] }
   0x6   :  { %73 = vmatpush.msra.mxu1 %v64_v4  ;;  %v53_v15 = vld [vmem:[%s196_s3 + $0x10] sm:$0xff]  ;;  %v52_v16 = vld [vmem:[%s196_s3 + $0x8] sm:$0xff]  ;;  %v51_v17 = vld [vmem:[%s196_s3] sm:$0xff] }
   0x7   :  { %v97_v18 = vld [vmem:[%s197_s2] ss:$0 sm:$0xff] }
   0x8   :  { %74 = vmatpush.msra.mxu1 %v63_v5  ;;  %v98_v22 = vld [vmem:[%s198_s4] ss:$0 sm:$0xff] }
   0xa   :  { %75 = vmatpush.msra.mxu1 %v62_v6 }
   0xc   :  { %76 = vmatpush.msra.mxu1 %v61_v7 }
   0xe   :  { %77 = vmatpush.msra.mxu1 %v60_v8 }
  0x10   :  { %78 = vmatpush.msra.mxu1 %v59_v9 }
  0x12   :  { %79 = vmatpush.msra.mxu1 %v58_v10 }
  0x14   :  { %80 = vmatpush.msra.mxu1 %v57_v11 }
  0x16   :  { %81 = vmatpush.msra.mxu1 %v56_v12 }
  0x18   :  { %82 = vmatpush.msra.mxu1 %v55_v13 }
  0x1a   :  { %83 = vmatpush.msra.mxu1 %v54_v14 }
  0x1c   :  { %84 = vmatpush.msra.mxu1 %v53_v15 }
  0x1e   :  { %85 = vmatpush.msra.mxu1 %v52_v16 }
  0x20   :  { %86 = vmatpush.msra.mxu1 %v51_v17 }
  0x80   :  { %v47_v19 = vpop.f32.mrf.mxu0 }
  0x81   :  { %v48_v20 = vadd.f32 %v97_v18, %v47_v19 }
  0x83   :  { %v50_v21 = vmax.f32 %v48_v20, 0.0 }
  0x85   :  { %87 = vmatmul.f32.vlgmr.msra.gmra.mxu1 %v50_v21 }
 0x102   :  { %v88_v23 = vpop.f32.mrf.mxu1 }
 0x103   :  { %v89_v24 = vadd.f32 %v98_v22, %v88_v23 }
 0x105   :  { %91 = vst.msk [vmem:[%s199_s5] sm:$0xff] %vm26_vm0, %v89_v24 }

</bundles_post_ra>
